<compile_context>
chip_gen: v7x
topology: tpu7x:2x2x1
jax: 0.10.0
libtpu: 0.0.40
codegen_flags: <defaults>
</compile_context>

<pallas_src>
import jax
import jax.numpy as jnp
from jax.experimental import pallas as pl
from jax.experimental.pallas import tpu as pltpu

LEAKY_SLOPE = 0.01      # nn.LeakyReLU default
NORM_EPS = 1e-12        # F.normalize default eps


def _proj_head_kernel(x_ref, w_ref, b_ref, o_ref):
    # Single fused matmul (MXU, f32 accumulation) + bias
    y = jnp.dot(x_ref[...], w_ref[...],
                preferred_element_type=jnp.float32) + b_ref[...]

    # LeakyReLU (padded lanes are exactly 0 -> stay 0)
    y = jnp.where(y >= 0.0, y, LEAKY_SLOPE * y)

    # F.normalize(dim=1): multiply by rsqrt(max(sum(y^2), eps^2))
    # (identical to dividing by max(||y||, eps); sqrt is monotone).
    # Lane-axis reduce -> XLU; rsqrt -> EUP; both off the VPU critical slot.
    sumsq = jnp.sum(y * y, axis=-1, keepdims=True)
    inv = jax.lax.rsqrt(jnp.maximum(sumsq, NORM_EPS * NORM_EPS))
    o_ref[...] = (y * inv).astype(o_ref.dtype)


def proj_head_forward(x, w1, b1, w2, b2, l2_norm=True, block_b=512):
    """x: (B, n_dim); w1: (n_dim, n_dim); b1: (1, n_dim);
       w2: (n_dim, last_dim); b2: (1, last_dim) -> (B, last_dim).
       Weights are passed pre-transposed to (in, out)."""
    # TODO(synk): l2_norm=False branch not exposed through the kernel
    # (kernel always normalizes, matching the default forward(x, l2_norm=True)).
    assert l2_norm, "kernel implements the default l2_norm=True path"
    B, n_dim = x.shape
    last_dim = w2.shape[1]

    # ---- Algebraic fusion of the two bias-only linears (done once, in f32) ----
    w_f = jnp.dot(w1.astype(jnp.float32), w2.astype(jnp.float32),
                  preferred_element_type=jnp.float32)
    b_f = jnp.dot(b1.astype(jnp.float32), w2.astype(jnp.float32),
                  preferred_element_type=jnp.float32) + b2.astype(jnp.float32)

    # ---- Lane-dense output: zero-pad feature dim to a multiple of 128 ----
    pad_dim = ((last_dim + 127) // 128) * 128
    if pad_dim != last_dim:
        w_f = jnp.pad(w_f, ((0, 0), (0, pad_dim - last_dim)))
        b_f = jnp.pad(b_f, ((0, 0), (0, pad_dim - last_dim)))
    w_f = w_f.astype(x.dtype)   # feed MXU in the input's native dtype
    b_f = b_f                   # keep bias in f32 (added to f32 accumulator)

    # ---- Batch tiling: largest-that-fits tile, multiple of 8 sublanes ----
    tb = min(block_b, B)
    if tb != B:
        tb = max(8, (tb // 8) * 8)
    grid = (pl.cdiv(B, tb),)

    out_padded = pl.pallas_call(
        _proj_head_kernel,
        out_shape=jax.ShapeDtypeStruct((B, pad_dim), x.dtype),
        grid=grid,
        in_specs=[
            pl.BlockSpec((tb, n_dim), lambda i: (i, 0)),      # x: streamed tiles
            pl.BlockSpec((n_dim, pad_dim), lambda i: (0, 0)), # fused W: resident
            pl.BlockSpec((1, pad_dim), lambda i: (0, 0)),     # fused b: resident
        ],
        out_specs=pl.BlockSpec((tb, pad_dim), lambda i: (i, 0)),
        compiler_params=pltpu.CompilerParams(
            dimension_semantics=("parallel",)),
    )(x, w_f, b_f)

    return out_padded[:, :last_dim]


def init_params(key, n_dim, last_dim):
    """Deterministic PyTorch-style nn.Linear init (uniform +/- 1/sqrt(fan_in)).
       Weights returned already transposed to (in, out)."""
    k1, k2, k3, k4 = jax.random.split(key, 4)
    lim1 = 1.0 / jnp.sqrt(n_dim)
    w1 = jax.random.uniform(k1, (n_dim, n_dim), jnp.float32, -lim1, lim1)
    b1 = jax.random.uniform(k2, (1, n_dim), jnp.float32, -lim1, lim1)
    lim2 = 1.0 / jnp.sqrt(n_dim)
    w2 = jax.random.uniform(k3, (n_dim, last_dim), jnp.float32, -lim2, lim2)
    b2 = jax.random.uniform(k4, (1, last_dim), jnp.float32, -lim2, lim2)
    return w1, b1, w2, b2


def _reference(x, w1, b1, w2, b2):
    y = x @ w1 + b1
    y = y @ w2 + b2
    y = jnp.where(y >= 0.0, y, LEAKY_SLOPE * y)
    n = jnp.sqrt(jnp.sum(y * y, axis=1, keepdims=True))
    return y / jnp.maximum(n, NORM_EPS)


if __name__ == "__main__":
    B, n_dim, last_dim = 8, 32, 16
    key = jax.random.PRNGKey(0)
    kx, kp = jax.random.split(key)
    x = jax.random.normal(kx, (B, n_dim), jnp.float32)
    w1, b1, w2, b2 = init_params(kp, n_dim, last_dim)

    out = proj_head_forward(x, w1, b1, w2, b2)
    out = jax.block_until_ready(out)

    ref = _reference(x, w1, b1, w2, b2)
    assert out.shape == (B, last_dim)
    assert jnp.allclose(out, ref, atol=1e-5, rtol=1e-5)
    print("KERNEL_OK")
</pallas_src>

<mosaic_0001>
module attributes {stable_mosaic.version = 11 : i64} {
  func.func @_proj_head_kernel(%arg0: i32, %arg1: memref<8x32xf32, #tpu.memory_space<vmem>>, %arg2: memref<32x128xf32, #tpu.memory_space<vmem>>, %arg3: memref<1x128xf32, #tpu.memory_space<vmem>>, %arg4: memref<8x128xf32, #tpu.memory_space<vmem>>) attributes {dimension_semantics = [#tpu.dimension_semantics<parallel>], iteration_bounds = array<i64: 1>, scalar_prefetch = 0 : i64, scratch_operands = 0 : i64, tpu.core_type = #tpu.core_type<tc>, window_params = [{transform_indices = @transform_0, window_bounds = array<i64: 8, 32>}, {pipeline_mode = #tpu.pipeline_mode<synchronous>, transform_indices = @transform_1, window_bounds = array<i64: 32, 128>}, {pipeline_mode = #tpu.pipeline_mode<synchronous>, transform_indices = @transform_2, window_bounds = array<i64: 1, 128>}, {transform_indices = @transform_3, window_bounds = array<i64: 8, 128>}]} {
    %c0 = arith.constant 0 : index
    %c0_0 = arith.constant 0 : index
    %0 = vector.load %arg1[%c0, %c0_0] : memref<8x32xf32, #tpu.memory_space<vmem>>, vector<8x32xf32>
    %c0_1 = arith.constant 0 : index
    %c0_2 = arith.constant 0 : index
    %1 = vector.load %arg2[%c0_1, %c0_2] : memref<32x128xf32, #tpu.memory_space<vmem>>, vector<32x128xf32>
    %cst = arith.constant dense<0.000000e+00> : vector<8x128xf32>
    %2 = tpu.matmul %0, %1, %cst {dimension_numbers = #tpu.dot_dimension_numbers<[1], [0], [0], [1], [0, 0, 1, 1], [], []>} : vector<8x32xf32>, vector<32x128xf32>, vector<8x128xf32> -> vector<8x128xf32>
    %c0_3 = arith.constant 0 : index
    %c0_4 = arith.constant 0 : index
    %3 = vector.load %arg3[%c0_3, %c0_4] : memref<1x128xf32, #tpu.memory_space<vmem>>, vector<1x128xf32>
    %4 = vector.broadcast %3 : vector<1x128xf32> to vector<8x128xf32>
    %5 = arith.addf %2, %4 : vector<8x128xf32>
    %cst_5 = arith.constant 0.000000e+00 : f32
    %6 = vector.broadcast %cst_5 : f32 to vector<8x128xf32>
    %7 = arith.cmpf oge, %5, %6 : vector<8x128xf32>
    %cst_6 = arith.constant 0.00999999977 : f32
    %8 = vector.broadcast %cst_6 : f32 to vector<8x128xf32>
    %9 = arith.mulf %8, %5 : vector<8x128xf32>
    %10 = arith.select %7, %5, %9 : vector<8x128xi1>, vector<8x128xf32>
    %11 = arith.mulf %10, %10 : vector<8x128xf32>
    %cst_7 = arith.constant dense<0.000000e+00> : vector<8xf32>
    %12 = vector.multi_reduction <add>, %11, %cst_7 [1] : vector<8x128xf32> to vector<8xf32>
    %13 = vector.shape_cast %12 : vector<8xf32> to vector<8x1xf32>
    %cst_8 = arith.constant 1.000000e-24 : f32
    %14 = vector.broadcast %cst_8 : f32 to vector<8x1xf32>
    %15 = arith.maximumf %13, %14 : vector<8x1xf32>
    %16 = math.rsqrt %15 : vector<8x1xf32>
    %17 = vector.broadcast %16 : vector<8x1xf32> to vector<8x128xf32>
    %18 = arith.mulf %10, %17 : vector<8x128xf32>
    %c0_9 = arith.constant 0 : index
    %c0_10 = arith.constant 0 : index
    %19 = vector.load %arg4[%c0_9, %c0_10] : memref<8x128xf32, #tpu.memory_space<vmem>>, vector<8x128xf32>
    tpu.vector_store %arg4[%c0_9, %c0_10], %18 {strides = array<i32>} : memref<8x128xf32, #tpu.memory_space<vmem>>, vector<8x128xf32>,
    return
  }
  func.func @transform_0(%arg0: i32) -> (i32, i32) {
    %c0_i32 = arith.constant 0 : i32
    %c0_i32_0 = arith.constant 0 : i32
    return %arg0, %c0_i32 : i32, i32
  }
  func.func @transform_1(%arg0: i32) -> (i32, i32) {
    %c0_i32 = arith.constant 0 : i32
    %c0_i32_0 = arith.constant 0 : i32
    %c0_i32_1 = arith.constant 0 : i32
    return %c0_i32, %c0_i32_0 : i32, i32
  }
  func.func @transform_2(%arg0: i32) -> (i32, i32) {
    %c0_i32 = arith.constant 0 : i32
    %c0_i32_0 = arith.constant 0 : i32
    %c0_i32_1 = arith.constant 0 : i32
    return %c0_i32, %c0_i32_0 : i32, i32
  }
  func.func @transform_3(%arg0: i32) -> (i32, i32) {
    %c0_i32 = arith.constant 0 : i32
    %c0_i32_0 = arith.constant 0 : i32
    return %arg0, %c0_i32 : i32, i32
  }
}

</mosaic_0001>

<bundles_post_ra>
// kernel: tpu_custom_call.1
= control target key start
LH: loop header
LB: loop body
LE: loop exit
PB: predicated region body
PF: predicated region fallthrough
CT: control target
= control target key end

     0   :  { %8 = vsyncpa [#allocation3], 0  ;;  %s333_s0 = inlined_call_operand.hbm [shape: f32[8,32], index: 0, kind: input, shape index: {}]   ;;  %s334_s1 = inlined_call_operand.hbm [shape: f32[32,128], index: 1, kind: input, shape index: {}]   ;;  %s335_s2 = inlined_call_operand.vmem [shape: f32[1,128], index: 2, kind: input, shape index: {}]   ;;  %s336_s3 = inlined_call_operand.hbm [shape: f32[8,128], index: 3, kind: output, shape index: {}]  }
   0x1   :  { %9 = vsyncpa [#allocation6], 0 }
   0x2   :  { %10 = vsyncpa [#allocation4], 0  ;;  %s259_s12 = smov [#allocation2]   ;;  %s260_s14 = smov [#allocation5]  }
   0x3   :  { %s17_s13 = sshll.u32 %s259_s12, 4  ;;  %s26_s15 = sshll.u32 %s260_s14, 4  ;;  %s18_s13 = int_to_ptr.vmem [resolvable:$true] %s17_s13  ;;  %s287_s15 = int_to_ptr.vmem [resolvable:$true] %s26_s15 }
   0x4   :  { %s187_s18 = scalar_lea.hbm %s333_s0, 128 }
   0x5   :  { %p188_p0 = scmp.ne.s32.totalorder %s333_s0, %s187_s18  ;;  %p191_p1 = scmp.lt.u32.totalorder %s187_s18, %s333_s0 }
   0x7   :  { %p193_p2 = pnand %p191_p1, %p188_p0 }
   0x9   :  { %196 = shalt.err (!%p193_p2)
}
   0xa   :  { %s197_s23 = scalar_lea.vmem %s18_s13, 128  ;;  %p202_p4 = scmp.lt.s32.totalorder %s18_s13, %s18_s13 }
   0xb   :  { %p198_p3 = scmp.ne.s32.totalorder %s18_s13, %s197_s23  ;;  %p203_p5 = scmp.lt.s32.totalorder %s197_s23, %s197_s23 }
   0xd   :  { %p204_p6 = por %p203_p5, %p202_p4 }
   0xf   :  { %p205_p7 = pnand %p204_p6, %p198_p3 }
  0x11   :  { %208 = shalt.err (!%p205_p7)
}
  0x12   :  { %20 = dma.hbm_to_vmem [thread:$0]  %s333_s0, 128, %s18_s13, [#allocation3]  }
  0x13   :  { %s209_s28 = scalar_lea.hbm %s334_s1, 512 }
  0x14   :  { %p210_p8 = scmp.ne.s32.totalorder %s334_s1, %s209_s28  ;;  %p213_p9 = scmp.lt.u32.totalorder %s209_s28, %s334_s1 }
  0x16   :  { %p215_p10 = pnand %p213_p9, %p210_p8 }
  0x18   :  { %218 = shalt.err (!%p215_p10)
}
  0x19   :  { %s219_s6 = scalar_lea.vmem %s287_s15, 512  ;;  %p224_p12 = scmp.lt.s32.totalorder %s287_s15, %s287_s15 }
  0x1a   :  { %p220_p11 = scmp.ne.s32.totalorder %s287_s15, %s219_s6  ;;  %p225_p13 = scmp.lt.s32.totalorder %s219_s6, %s219_s6 }
  0x1c   :  { %p226_p0 = por %p225_p13, %p224_p12 }
  0x1e   :  { %p227_p1 = pnand %p226_p0, %p220_p11 }
  0x20   :  { %230 = shalt.err (!%p227_p1)
}
  0x21   :  { %s261_s0 = smov 128   ;;  %s262_s7 = smov 8  }
  0x22   :  { %32 = dma.hbm_to_vmem [thread:$0]  %s334_s1, 512, %s287_s15, [#allocation6], %s261_s0, %s261_s0, %s262_s7  }
  0x23   :  { %253 = dma.done.wait [#allocation3], 128  }
  0x24   :  { %254 = vsyncadd [#allocation3], 4294967168 }
  0x25   :  { %255 = dma.done.wait [#allocation6], 512  }
  0x26   :  { %256 = vsyncadd [#allocation6], 4294966784  ;;  %v263_v0 = vmov 0.0|0.0   ;;  %vm264_vm0 = vmmov 0   ;;  %v265_v1 = vmov 0.0   ;;  %v42_v2 = vld [vmem:[#allocation5] sm:$0xff] }
  0x27   :  { %171 = vmatprep.subr.bf16.mxu0 %v263_v0  ;;  %168 = vmatprep.mubr.msk.f32.mxu0 %vm264_vm0, %v265_v1  ;;  %v43_v3 = vld [vmem:[#allocation5 + $0x8] sm:$0xff]  ;;  %v44_v4 = vld [vmem:[#allocation5 + $0x10] sm:$0xff]  ;;  %v45_v6 = vld [vmem:[#allocation5 + $0x18] sm:$0xff]  ;;  %vm53_vm1 = vcmask 261120   ;;  %s266_s11 = smov [#allocation7]  }
  0x28   :  { %v172_v5 = vpack.c.bf16 %v43_v3, %v42_v2  ;;  %v175_v7 = vpack.c.bf16 %v45_v6, %v44_v4  ;;  %v41_v8 = vld [vmem:[#allocation2] sm:$0xff]  ;;  %s143_s12 = sshll.u32 %s266_s11, 4  ;;  %s144_s12 = int_to_ptr.vmem [resolvable:$true] %s143_s12 }
  0x29   :  { %v153_v9 = vld [vmem:[%s335_s2] ss:$0 sm:$0xff]  ;;  %s231_s13 = scalar_lea.vmem %s144_s12, 128  ;;  %p236_p3 = scmp.lt.s32.totalorder %s144_s12, %s144_s12 }
  0x2a   :  { %173 = vmatpush3.bf16.msra.mxu0 %v172_v5  ;;  %p232_p2 = scmp.ne.s32.totalorder %s144_s12, %s231_s13  ;;  %p237_p4 = scmp.lt.s32.totalorder %s231_s13, %s231_s13 }
  0x2b   :  { %174 = vmatprep.subr.bf16.mxu0 %v263_v0 }
  0x2c   :  { %p238_p5 = por %p237_p4, %p236_p3 }
  0x2e   :  { %176 = vmatpush3.bf16.msra.mxu0 %v175_v7  ;;  %p239_p6 = pnand %p238_p5, %p232_p2 }
  0x31   :  { %169 = vmatmul.mubr.msk.f32.vlgmr.msra.gmra.mrb[0].mxu0 %vm53_vm1, %v41_v8 }
 0x104   :  { %v123_v10 = vpop.f32.mrb[0].mxu0 }
 0x105   :  { %v124_v11 = vadd.f32 %v153_v9, %v123_v10  ;;  %v170_v12 = vpop.f32.mrb[1].mxu0 }
 0x107   :  { %v128_v13 = vmul.f32 0.01, %v124_v11  ;;  %vm127_vm2 = vcmp.ge.f32.partialorder %v124_v11, 0.0 }
 0x109   :  { %v129_v14 = vsel %vm127_vm2, %v124_v11, %v128_v13 }
 0x10a   :  { %v130_v15 = vmul.f32 %v129_v14, %v129_v14 }
 0x10c   :  { %131 = vadd.xlane.f32.xlu0 %v130_v15 }
 0x199   :  { %v132_v16 = vpop.xlane.xlu0 %131 }
 0x19a   :  { %v133_v17 = vmax.f32 %v132_v16, 1e-24 }
 0x19c   :  { %185 = vrsqrt.f32 %v133_v17 }
 0x1a6   :  { %v186_v18 = vpop.eup %185 }
 0x1a7   :  { %v135_v19 = vmul.f32 %v186_v18, %v129_v14 }
 0x1a9   :  { %136 = vst [vmem:[#allocation7] sm:$0xff] %v135_v19 }
 0x1aa   :  { %242 = shalt.err (!%p239_p6)
}
 0x1ab   :  { %s243_s15 = scalar_lea.hbm %s336_s3, 128 }
 0x1ac   :  { %p244_p7 = scmp.ne.s32.totalorder %s336_s3, %s243_s15  ;;  %p247_p8 = scmp.lt.u32.totalorder %s243_s15, %s336_s3 }
 0x1ae   :  { %p249_p9 = pnand %p247_p8, %p244_p7 }
 0x1b0   :  { %252 = shalt.err (!%p249_p9)
}
 0x1b1   :  { %146 = dma.vmem_to_hbm [thread:$0]  %s144_s12, 128, %s336_s3, [#allocation4]  }
 0x1b2   :  { %257 = dma.done.wait [#allocation4], 128  }
 0x1b3   :  { %258 = vsyncadd [#allocation4], 4294967168 }
 0x1b4   :  { %150 = vsyncpa [#allocation3], 1 }
 0x1b5   :  { %151 = vsyncpa [#allocation6], 1 }
 0x1b6   :  { %152 = vsyncpa [#allocation4], 1 }

</bundles_post_ra>
